<compile_context>
chip_gen: v5e
topology: v5e:2x2
jax: 0.10.0
libtpu: 0.0.40
codegen_flags: <defaults>
</compile_context>

<pallas_src>
import jax
import jax.numpy as jnp
from jax.experimental import pallas as pl
from jax.experimental.pallas import tpu as pltpu

_LANE = 128


def linear_kernel(x_ref, w_ref, b_ref, o_ref):
    # Whole problem lives in VMEM (tiny shapes). Matmul on the MXU with f32
    # accumulation, then broadcast-add the (1, 128) bias row. Output lane dim
    # is 128-wide -> full unmasked vector stores.
    acc = jnp.dot(x_ref[...], w_ref[...], preferred_element_type=jnp.float32)
    o_ref[...] = (acc + b_ref[...]).astype(o_ref.dtype)


def linear_pallas(x, w, b):
    """y = x @ w + b with lane-padded operands; x:(B,K), w:(K,N), b:(N,)."""
    B, in_f = x.shape
    _, out_f = w.shape

    # Pad the lane (last) dim to a multiple of 128 for lane-dense MXU RHS and
    # unmasked output stores; zeros in the padded columns keep the math exact.
    out_p = ((out_f + _LANE - 1) // _LANE) * _LANE
    w_p = jnp.zeros((in_f, out_p), w.dtype).at[:, :out_f].set(w)
    b_p = jnp.zeros((1, out_p), b.dtype).at[0, :out_f].set(b)

    cost = pl.CostEstimate(
        flops=2 * B * in_f * out_f,
        transcendentals=0,
        bytes_accessed=4 * (B * in_f + in_f * out_p + out_p + B * out_p),
    )

    y_p = pl.pallas_call(
        linear_kernel,
        out_shape=jax.ShapeDtypeStruct((B, out_p), x.dtype),
        in_specs=[
            pl.BlockSpec(memory_space=pltpu.MemorySpace.VMEM),
            pl.BlockSpec(memory_space=pltpu.MemorySpace.VMEM),
            pl.BlockSpec(memory_space=pltpu.MemorySpace.VMEM),
        ],
        out_specs=pl.BlockSpec(memory_space=pltpu.MemorySpace.VMEM),
        cost_estimate=cost,
    )(x, w_p, b_p)

    # Slice away the lane padding outside the kernel.
    return y_p[:, :out_f]


if __name__ == "__main__":
    in_features, out_features = 10, 5
    batch = 8

    key = jax.random.PRNGKey(0)
    kx, kw, kb = jax.random.split(key, 3)

    # Deterministic parameter init (kaiming-uniform-like bound for weight, normal bias)
    bound = jnp.sqrt(6.0 / in_features)
    w = jax.random.uniform(
        kw, (in_features, out_features), jnp.float32, minval=-bound, maxval=bound
    )
    b = jax.random.normal(kb, (out_features,), jnp.float32)
    x = jax.random.normal(kx, (batch, in_features), jnp.float32)

    y = linear_pallas(x, w, b)
    jax.block_until_ready(y)

    # Reference check against plain JAX
    y_ref = x @ w + b
    assert y.shape == (batch, out_features)
    assert jnp.allclose(y, y_ref, atol=1e-5, rtol=1e-5)

    print("KERNEL_OK")
</pallas_src>

<mosaic_0001>
module attributes {stable_mosaic.version = 11 : i64} {
  func.func @linear_kernel(%arg0: memref<8x10xf32, #tpu.memory_space<vmem>>, %arg1: memref<10x128xf32, #tpu.memory_space<vmem>>, %arg2: memref<1x128xf32, #tpu.memory_space<vmem>>, %arg3: memref<8x128xf32, #tpu.memory_space<vmem>>) attributes {dimension_semantics = [], scalar_prefetch = 0 : i64, scratch_operands = 0 : i64, tpu.core_type = #tpu.core_type<tc>} {
    %c0 = arith.constant 0 : index
    %c0_0 = arith.constant 0 : index
    %0 = vector.load %arg0[%c0, %c0_0] : memref<8x10xf32, #tpu.memory_space<vmem>>, vector<8x10xf32>
    %c0_1 = arith.constant 0 : index
    %c0_2 = arith.constant 0 : index
    %1 = vector.load %arg1[%c0_1, %c0_2] : memref<10x128xf32, #tpu.memory_space<vmem>>, vector<10x128xf32>
    %cst = arith.constant dense<0.000000e+00> : vector<8x128xf32>
    %2 = tpu.matmul %0, %1, %cst {dimension_numbers = #tpu.dot_dimension_numbers<[1], [0], [0], [1], [0, 0, 1, 1], [], []>} : vector<8x10xf32>, vector<10x128xf32>, vector<8x128xf32> -> vector<8x128xf32>
    %c0_3 = arith.constant 0 : index
    %c0_4 = arith.constant 0 : index
    %3 = vector.load %arg2[%c0_3, %c0_4] : memref<1x128xf32, #tpu.memory_space<vmem>>, vector<1x128xf32>
    %4 = vector.broadcast %3 : vector<1x128xf32> to vector<8x128xf32>
    %5 = arith.addf %2, %4 : vector<8x128xf32>
    %c0_5 = arith.constant 0 : index
    %c0_6 = arith.constant 0 : index
    %6 = vector.load %arg3[%c0_5, %c0_6] : memref<8x128xf32, #tpu.memory_space<vmem>>, vector<8x128xf32>
    tpu.vector_store %arg3[%c0_5, %c0_6], %5 {strides = array<i32>} : memref<8x128xf32, #tpu.memory_space<vmem>>, vector<8x128xf32>,
    return
  }
}

</mosaic_0001>

<bundles_post_ra>
// kernel: tpu_custom_call.1
= control target key start
LH: loop header
LB: loop body
LE: loop exit
PB: predicated region body
PF: predicated region fallthrough
CT: control target
= control target key end

     0   :  { %8 = vsyncpa [#allocation3], 0  ;;  %s222_s0 = inlined_call_operand.hbm [shape: f32[8,10], index: 0, kind: input, shape index: {}]   ;;  %s223_s1 = inlined_call_operand.hbm [shape: f32[10,128], index: 1, kind: input, shape index: {}]   ;;  %s224_s2 = inlined_call_operand.vmem [shape: f32[1,128], index: 2, kind: input, shape index: {}]   ;;  %s225_s3 = inlined_call_operand.hbm [shape: f32[8,128], index: 3, kind: output, shape index: {}]  }
   0x1   :  { %9 = vsyncpa [#allocation6], 0 }
   0x2   :  { %10 = vsyncpa [#allocation4], 0  ;;  %s16_s14 = sshll.u32 %s222_s0, 4  ;;  %s185_s15 = smov [#allocation2]   ;;  %s17_s14 = int_to_ptr.hbm [resolvable:$true] %s16_s14 }
   0x3   :  { %s18_s16 = sshll.u32 %s185_s15, 4  ;;  %s26_s19 = sshll.u32 %s223_s1, 4  ;;  %s19_s16 = int_to_ptr.vmem [resolvable:$true] %s18_s16  ;;  %s27_s19 = int_to_ptr.hbm [resolvable:$true] %s26_s19 }
   0x4   :  { %21 = dma.hbm_to_vmem [thread:$0]  %s17_s14, 128, %s19_s16, [#allocation3]  }
   0x5   :  { %s186_s20 = smov [#allocation5]   ;;  %s187_s22 = smov 128  }
   0x6   :  { %s28_s21 = sshll.u32 %s186_s20, 4  ;;  %s188_s23 = smov 8   ;;  %s29_s21 = int_to_ptr.vmem [resolvable:$true] %s28_s21 }
   0x7   :  { %34 = dma.hbm_to_vmem [thread:$0]  %s27_s19, 256, %s29_s21, [#allocation6], %s187_s22, %s187_s22, %s188_s23  }
   0x8   :  { %179 = dma.done.wait [#allocation3], 128  }
   0x9   :  { %180 = vsyncadd [#allocation3], 4294967168 }
   0xa   :  { %181 = dma.done.wait [#allocation6], 256  }
   0xb   :  { %182 = vsyncadd [#allocation6], 4294967040  ;;  %vm56_vm0 = vcmask 1041408   ;;  %v47_v0 = vld [vmem:[#allocation5 + $0x8] sm:$0x3]  ;;  %v46_v1 = vld [vmem:[#allocation5] sm:$0xff] }
   0xc   :  { %99 = vmatpush.msk.msra.mxu0 %vm56_vm0, %v47_v0  ;;  %v45_v2 = vld [vmem:[#allocation2] sm:$0xff]  ;;  %vm52_vm1 = vcmask 80896   ;;  %s189_s24 = smov [#allocation7]   ;;  %s88_s28 = sshll.u32 %s225_s3, 4  ;;  %s89_s28 = int_to_ptr.hbm [resolvable:$true] %s88_s28 }
   0xd   :  { %v106_v3 = vld [vmem:[%s224_s2] ss:$0 sm:$0xff]  ;;  %s86_s25 = sshll.u32 %s189_s24, 4  ;;  %s87_s25 = int_to_ptr.vmem [resolvable:$true] %s86_s25 }
   0xe   :  { %75 = vmatpush.msra.mxu0 %v46_v1 }
   0xf   :  { %100 = vmatmul.msk.f32.vlgmr.msra.gmra.mxu0 %vm52_vm1, %v45_v2 }
  0x8c   :  { %v77_v4 = vpop.f32.mrf.mxu0 }
  0x8d   :  { %v78_v5 = vadd.f32 %v106_v3, %v77_v4 }
  0x8f   :  { %80 = vst [vmem:[#allocation7] sm:$0xff] %v78_v5 }
  0x90   :  { %91 = dma.vmem_to_hbm [thread:$0]  %s87_s25, 128, %s89_s28, [#allocation4]  }
  0x91   :  { %183 = dma.done.wait [#allocation4], 128  }
  0x92   :  { %184 = vsyncadd [#allocation4], 4294967168 }
  0x93   :  { %96 = vsyncpa [#allocation3], 1 }
  0x94   :  { %97 = vsyncpa [#allocation6], 1 }
  0x95   :  { %98 = vsyncpa [#allocation4], 1 }

</bundles_post_ra>
